<compile_context>
chip_gen: v7x
topology: tpu7x:2x2x1
jax: 0.10.0
libtpu: 0.0.40
codegen_flags: <defaults>
</compile_context>

<pallas_src>
import functools

import jax
import jax.numpy as jnp
from jax import lax
from jax.experimental import pallas as pl
from jax.experimental.pallas import tpu as pltpu


def _round_up(n: int, m: int) -> int:
    return ((n + m - 1) // m) * m


def _vmem_budget_bytes() -> int:
    """Per-TensorCore VMEM budget, leaving headroom for compiler scratch."""
    cap = None
    try:
        info = pltpu.get_tpu_info()
        for name in ("vmem_capacity_bytes", "vmem_size_bytes", "vmem_bytes"):
            v = getattr(info, name, None)
            if v:
                cap = int(v)
                break
    except Exception:
        cap = None
    if not cap:
        cap = 64 * 1024 * 1024  # conservative fallback: v7x per-TC VMEM
    return max(32 * 1024 * 1024, int(cap * 0.80))


def _pick_tdh(D, Dh, tm, x_bytes, w_bytes, o_bytes, budget):
    """Largest hidden-dim slice (preferring full width, then 256/128 multiples)
    whose resident VMEM footprint fits the budget."""
    io = 2 * tm * D * x_bytes + 2 * tm * D * o_bytes       # double-buffered in/out
    vecs = (Dh + 3 * D) * max(w_bytes, 4)                  # b1/b2/gamma/beta
    # Full width: single-buffered weights, no accumulator scratch.
    if io + vecs + 2 * D * Dh * w_bytes <= budget:
        return Dh
    # Sliced: double-buffered W1/W2 slices + f32 accumulator scratch.
    fixed = io + vecs + tm * D * 4
    for granule in (256, 128):
        if Dh % granule:
            continue
        t = Dh
        while t >= granule:
            if Dh % t == 0 and fixed + 2 * (2 * D * t) * w_bytes <= budget:
                return t
            t -= granule
    return Dh  # no clean slicing; fall back to full width and let XLA cope


# ---------------------------------------------------------------------------
# Kernels
# ---------------------------------------------------------------------------
def _ln_epilogue(y, gamma, beta, eps):
    mean = jnp.mean(y, axis=-1, keepdims=True)
    centered = y - mean
    var = jnp.mean(centered * centered, axis=-1, keepdims=True)
    return centered * lax.rsqrt(var + eps) * gamma + beta


def _ffn_fused_kernel(x_ref, w1_ref, b1_ref, w2_ref, b2_ref, gamma_ref,
                      beta_ref, o_ref, *, eps: float):
    """Single-step hidden dim: straight-line body, no accumulator scratch."""
    x = x_ref[...]
    h = jnp.dot(x, w1_ref[...], preferred_element_type=jnp.float32)
    h = jnp.maximum(h + b1_ref[...].astype(jnp.float32), 0.0)
    y = jnp.dot(h.astype(w2_ref.dtype), w2_ref[...],
                preferred_element_type=jnp.float32)
    y = y + b2_ref[...].astype(jnp.float32) + x.astype(jnp.float32)
    out = _ln_epilogue(y, gamma_ref[...].astype(jnp.float32),
                       beta_ref[...].astype(jnp.float32), eps)
    o_ref[...] = out.astype(o_ref.dtype)


def _ffn_acc_kernel(x_ref, w1_ref, b1_ref, w2_ref, b2_ref, gamma_ref,
                    beta_ref, o_ref, acc_ref, *, eps: float):
    """Hidden dim sliced (reduction axis k): accumulate linear2 partial sums."""
    k = pl.program_id(1)

    @pl.when(k == 0)
    def _init():
        acc_ref[...] = jnp.zeros_like(acc_ref)

    x = x_ref[...]
    h = jnp.dot(x, w1_ref[...], preferred_element_type=jnp.float32)
    h = jnp.maximum(h + b1_ref[...].astype(jnp.float32), 0.0)
    acc_ref[...] += jnp.dot(h.astype(w2_ref.dtype), w2_ref[...],
                            preferred_element_type=jnp.float32)

    @pl.when(k == pl.num_programs(1) - 1)
    def _finalize():
        y = acc_ref[...] + b2_ref[...].astype(jnp.float32) + x.astype(jnp.float32)
        out = _ln_epilogue(y, gamma_ref[...].astype(jnp.float32),
                           beta_ref[...].astype(jnp.float32), eps)
        o_ref[...] = out.astype(o_ref.dtype)


# ---------------------------------------------------------------------------
# Wrapper
# ---------------------------------------------------------------------------
def position_feedforward(x, w1, b1, w2, b2, gamma, beta, *, eps=1e-5,
                         tm=None, tdh=None, compute_dtype=None):
    """x: (batch, seq, d_model) -> (batch, seq, d_model)."""
    B, S, D = x.shape
    Dh = w1.shape[1]
    assert w1.shape == (D, Dh) and w2.shape == (Dh, D)
    M = B * S
    out_dtype = x.dtype

    x2d = x.reshape(M, D)
    if compute_dtype is not None:  # opt-in reduced-precision matmul inputs
        x2d = x2d.astype(compute_dtype)
        w1 = w1.astype(compute_dtype)
        w2 = w2.astype(compute_dtype)

    x_bytes = jnp.dtype(x2d.dtype).itemsize
    w_bytes = jnp.dtype(w1.dtype).itemsize
    o_bytes = jnp.dtype(out_dtype).itemsize
    budget = _vmem_budget_bytes()

    # Row tile: large tiles amortize per-grid-step overhead and keep the MXU fed.
    if tm is None:
        tm = 512 if x_bytes <= 2 else 256
    tm = max(8, min(_round_up(tm, 8), _round_up(M, 8)))
    # Keep >= 2 row tiles when there is enough work so the 'parallel' row axis
    # can shard across both TensorCores on dual-core chips (v7x).
    if pl.cdiv(M, tm) < 2 and M >= 256:
        tm = _round_up(pl.cdiv(M, 2), 8)
    n_row = pl.cdiv(M, tm)  # ragged last block handled by Pallas masking

    # Hidden-dim slice width (reduction axis).
    if tdh is None:
        tdh = _pick_tdh(D, Dh, tm, x_bytes, w_bytes, o_bytes, budget)
    assert Dh % tdh == 0
    if tdh != Dh:
        assert tdh % 128 == 0, "hidden-dim slice must be a multiple of 128 lanes"
    n_k = Dh // tdh

    # Vectors as (1, dim) rows.
    b1r = b1.reshape(1, Dh)
    b2r = b2.reshape(1, D)
    gr = gamma.reshape(1, D)
    br = beta.reshape(1, D)

    # Scheduling hint for XLA around the custom call.
    cost = pl.CostEstimate(
        flops=4 * M * D * Dh + 10 * M * D,
        transcendentals=M,
        bytes_accessed=(M * D * (x_bytes + o_bytes) + 2 * D * Dh * w_bytes
                        + (Dh + 3 * D) * 4),
    )

    resident = pl.Buffered(1)  # grid-invariant blocks: single VMEM copy

    if n_k == 1:
        kernel = functools.partial(_ffn_fused_kernel, eps=eps)
        grid = (n_row,)
        in_specs = [
            pl.BlockSpec((tm, D), lambda i: (i, 0)),
            pl.BlockSpec((D, Dh), lambda i: (0, 0), pipeline_mode=resident),
            pl.BlockSpec((1, Dh), lambda i: (0, 0), pipeline_mode=resident),
            pl.BlockSpec((Dh, D), lambda i: (0, 0), pipeline_mode=resident),
            pl.BlockSpec((1, D), lambda i: (0, 0), pipeline_mode=resident),
            pl.BlockSpec((1, D), lambda i: (0, 0), pipeline_mode=resident),
            pl.BlockSpec((1, D), lambda i: (0, 0), pipeline_mode=resident),
        ]
        out_specs = pl.BlockSpec((tm, D), lambda i: (i, 0))
        scratch = []
        semantics = ("parallel",)
    else:
        kernel = functools.partial(_ffn_acc_kernel, eps=eps)
        grid = (n_row, n_k)
        in_specs = [
            pl.BlockSpec((tm, D), lambda i, k: (i, 0)),
            pl.BlockSpec((D, tdh), lambda i, k: (0, k)),
            pl.BlockSpec((1, tdh), lambda i, k: (0, k)),
            pl.BlockSpec((tdh, D), lambda i, k: (k, 0)),
            pl.BlockSpec((1, D), lambda i, k: (0, 0), pipeline_mode=resident),
            pl.BlockSpec((1, D), lambda i, k: (0, 0), pipeline_mode=resident),
            pl.BlockSpec((1, D), lambda i, k: (0, 0), pipeline_mode=resident),
        ]
        out_specs = pl.BlockSpec((tm, D), lambda i, k: (i, 0))
        scratch = [pltpu.VMEM((tm, D), jnp.float32)]
        semantics = ("parallel", "arbitrary")

    out2d = pl.pallas_call(
        kernel,
        out_shape=jax.ShapeDtypeStruct((M, D), out_dtype),
        grid_spec=pltpu.PrefetchScalarGridSpec(
            num_scalar_prefetch=0,
            grid=grid,
            in_specs=in_specs,
            out_specs=out_specs,
            scratch_shapes=scratch,
        ),
        compiler_params=pltpu.CompilerParams(
            dimension_semantics=semantics,
            vmem_limit_bytes=budget,
        ),
        cost_estimate=cost,
    )(x2d, w1, b1r, w2, b2r, gr, br)

    return out2d.reshape(B, S, D)


# ---------------------------------------------------------------------------
# Reference + tests
# ---------------------------------------------------------------------------
def _reference(x, w1, b1, w2, b2, gamma, beta, eps=1e-5):
    h = jnp.maximum(x @ w1 + b1, 0.0)
    y = h @ w2 + b2 + x
    mean = jnp.mean(y, axis=-1, keepdims=True)
    var = jnp.mean((y - mean) ** 2, axis=-1, keepdims=True)
    return (y - mean) / jnp.sqrt(var + eps) * gamma + beta


def _make_params(key, D, Dh):
    k1, kb1, k2, kb2 = jax.random.split(key, 4)
    w1 = jax.random.normal(k1, (D, Dh), jnp.float32) * (1.0 / float(D) ** 0.5)
    b1 = jax.random.normal(kb1, (Dh,), jnp.float32) * 0.01
    w2 = jax.random.normal(k2, (Dh, D), jnp.float32) * (1.0 / float(Dh) ** 0.5)
    b2 = jax.random.normal(kb2, (D,), jnp.float32) * 0.01
    gamma = jnp.ones((D,), jnp.float32)
    beta = jnp.zeros((D,), jnp.float32)
    return w1, b1, w2, b2, gamma, beta


if __name__ == "__main__":
    key = jax.random.PRNGKey(0)
    kx1, kp1, kx2, kp2 = jax.random.split(key, 4)

    # Test 1: small shapes consistent with the module (fused single-step path,
    # full-width resident weights, no accumulator scratch).
    B, S, D, DH = 2, 8, 32, 64
    x = jax.random.normal(kx1, (B, S, D), dtype=jnp.float32)
    params = _make_params(kp1, D, DH)
    out = jax.block_until_ready(position_feedforward(x, *params))
    ref = _reference(x, *params)
    assert out.shape == (B, S, D)
    assert jnp.allclose(out, ref, atol=1e-4, rtol=1e-4), "mismatch (test 1)"

    # Test 2: exercise the hidden-dim reduction axis (tdh < d_hidden) and the
    # ragged last row block (M = 38 rows, no wrapper-side padding copies).
    B2, S2, D2, DH2 = 2, 19, 128, 256
    x2 = jax.random.normal(kx2, (B2, S2, D2), dtype=jnp.float32)
    params2 = _make_params(kp2, D2, DH2)
    out2 = jax.block_until_ready(
        position_feedforward(x2, *params2, tm=256, tdh=128))
    ref2 = _reference(x2, *params2)
    assert out2.shape == (B2, S2, D2)
    assert jnp.allclose(out2, ref2, atol=1e-4, rtol=1e-4), "mismatch (test 2)"

    print("KERNEL_OK")
</pallas_src>

<mosaic_0001>
module attributes {stable_mosaic.version = 11 : i64} {
  func.func @_ffn_fused_kernel(%arg0: i32, %arg1: memref<16x32xf32, #tpu.memory_space<vmem>>, %arg2: memref<32x64xf32, #tpu.memory_space<vmem>>, %arg3: memref<1x64xf32, #tpu.memory_space<vmem>>, %arg4: memref<64x32xf32, #tpu.memory_space<vmem>>, %arg5: memref<1x32xf32, #tpu.memory_space<vmem>>, %arg6: memref<1x32xf32, #tpu.memory_space<vmem>>, %arg7: memref<1x32xf32, #tpu.memory_space<vmem>>, %arg8: memref<16x32xf32, #tpu.memory_space<vmem>>) attributes {dimension_semantics = [#tpu.dimension_semantics<parallel>], iteration_bounds = array<i64: 1>, scalar_prefetch = 0 : i64, scratch_operands = 0 : i64, tpu.core_type = #tpu.core_type<tc>, window_params = [{transform_indices = @transform_0, window_bounds = array<i64: 16, 32>}, {pipeline_mode = #tpu.pipeline_mode<synchronous>, transform_indices = @transform_1, window_bounds = array<i64: 32, 64>}, {pipeline_mode = #tpu.pipeline_mode<synchronous>, transform_indices = @transform_2, window_bounds = array<i64: 1, 64>}, {pipeline_mode = #tpu.pipeline_mode<synchronous>, transform_indices = @transform_3, window_bounds = array<i64: 64, 32>}, {pipeline_mode = #tpu.pipeline_mode<synchronous>, transform_indices = @transform_4, window_bounds = array<i64: 1, 32>}, {pipeline_mode = #tpu.pipeline_mode<synchronous>, transform_indices = @transform_5, window_bounds = array<i64: 1, 32>}, {pipeline_mode = #tpu.pipeline_mode<synchronous>, transform_indices = @transform_6, window_bounds = array<i64: 1, 32>}, {transform_indices = @transform_7, window_bounds = array<i64: 16, 32>}]} {
    %c0 = arith.constant 0 : index
    %c0_0 = arith.constant 0 : index
    %0 = vector.load %arg1[%c0, %c0_0] : memref<16x32xf32, #tpu.memory_space<vmem>>, vector<16x32xf32>
    %c0_1 = arith.constant 0 : index
    %c0_2 = arith.constant 0 : index
    %1 = vector.load %arg2[%c0_1, %c0_2] : memref<32x64xf32, #tpu.memory_space<vmem>>, vector<32x64xf32>
    %cst = arith.constant dense<0.000000e+00> : vector<16x64xf32>
    %2 = tpu.matmul %0, %1, %cst {dimension_numbers = #tpu.dot_dimension_numbers<[1], [0], [0], [1], [0, 0, 1, 1], [], []>} : vector<16x32xf32>, vector<32x64xf32>, vector<16x64xf32> -> vector<16x64xf32>
    %c0_3 = arith.constant 0 : index
    %c0_4 = arith.constant 0 : index
    %3 = vector.load %arg3[%c0_3, %c0_4] : memref<1x64xf32, #tpu.memory_space<vmem>>, vector<1x64xf32>
    %4 = vector.broadcast %3 : vector<1x64xf32> to vector<16x64xf32>
    %5 = arith.addf %2, %4 : vector<16x64xf32>
    %cst_5 = arith.constant 0.000000e+00 : f32
    %6 = vector.broadcast %cst_5 : f32 to vector<16x64xf32>
    %7 = arith.maximumf %5, %6 : vector<16x64xf32>
    %c0_6 = arith.constant 0 : index
    %c0_7 = arith.constant 0 : index
    %8 = vector.load %arg4[%c0_6, %c0_7] : memref<64x32xf32, #tpu.memory_space<vmem>>, vector<64x32xf32>
    %cst_8 = arith.constant dense<0.000000e+00> : vector<16x32xf32>
    %9 = tpu.matmul %7, %8, %cst_8 {dimension_numbers = #tpu.dot_dimension_numbers<[1], [0], [0], [1], [0, 0, 1, 1], [], []>} : vector<16x64xf32>, vector<64x32xf32>, vector<16x32xf32> -> vector<16x32xf32>
    %c0_9 = arith.constant 0 : index
    %c0_10 = arith.constant 0 : index
    %10 = vector.load %arg5[%c0_9, %c0_10] : memref<1x32xf32, #tpu.memory_space<vmem>>, vector<1x32xf32>
    %11 = vector.broadcast %10 : vector<1x32xf32> to vector<16x32xf32>
    %12 = arith.addf %9, %11 : vector<16x32xf32>
    %13 = arith.addf %12, %0 : vector<16x32xf32>
    %c0_11 = arith.constant 0 : index
    %c0_12 = arith.constant 0 : index
    %14 = vector.load %arg6[%c0_11, %c0_12] : memref<1x32xf32, #tpu.memory_space<vmem>>, vector<1x32xf32>
    %c0_13 = arith.constant 0 : index
    %c0_14 = arith.constant 0 : index
    %15 = vector.load %arg7[%c0_13, %c0_14] : memref<1x32xf32, #tpu.memory_space<vmem>>, vector<1x32xf32>
    %cst_15 = arith.constant dense<0.000000e+00> : vector<16xf32>
    %16 = vector.multi_reduction <add>, %13, %cst_15 [1] : vector<16x32xf32> to vector<16xf32>
    %17 = vector.shape_cast %16 : vector<16xf32> to vector<16x1xf32>
    %cst_16 = arith.constant 3.200000e+01 : f32
    %18 = vector.broadcast %cst_16 : f32 to vector<16x1xf32>
    %19 = arith.divf %17, %18 : vector<16x1xf32>
    %20 = vector.broadcast %19 : vector<16x1xf32> to vector<16x32xf32>
    %21 = arith.subf %13, %20 : vector<16x32xf32>
    %22 = arith.mulf %21, %21 : vector<16x32xf32>
    %cst_17 = arith.constant dense<0.000000e+00> : vector<16xf32>
    %23 = vector.multi_reduction <add>, %22, %cst_17 [1] : vector<16x32xf32> to vector<16xf32>
    %24 = vector.shape_cast %23 : vector<16xf32> to vector<16x1xf32>
    %cst_18 = arith.constant 3.200000e+01 : f32
    %25 = vector.broadcast %cst_18 : f32 to vector<16x1xf32>
    %26 = arith.divf %24, %25 : vector<16x1xf32>
    %cst_19 = arith.constant 9.99999974E-6 : f32
    %27 = vector.broadcast %cst_19 : f32 to vector<16x1xf32>
    %28 = arith.addf %26, %27 : vector<16x1xf32>
    %29 = math.rsqrt %28 : vector<16x1xf32>
    %30 = vector.broadcast %29 : vector<16x1xf32> to vector<16x32xf32>
    %31 = arith.mulf %21, %30 : vector<16x32xf32>
    %32 = vector.broadcast %14 : vector<1x32xf32> to vector<16x32xf32>
    %33 = arith.mulf %31, %32 : vector<16x32xf32>
    %34 = vector.broadcast %15 : vector<1x32xf32> to vector<16x32xf32>
    %35 = arith.addf %33, %34 : vector<16x32xf32>
    %c0_20 = arith.constant 0 : index
    %c0_21 = arith.constant 0 : index
    %36 = vector.load %arg8[%c0_20, %c0_21] : memref<16x32xf32, #tpu.memory_space<vmem>>, vector<16x32xf32>
    tpu.vector_store %arg8[%c0_20, %c0_21], %35 {strides = array<i32>} : memref<16x32xf32, #tpu.memory_space<vmem>>, vector<16x32xf32>,
    return
  }
  func.func @transform_0(%arg0: i32) -> (i32, i32) {
    %c0_i32 = arith.constant 0 : i32
    %c0_i32_0 = arith.constant 0 : i32
    return %arg0, %c0_i32 : i32, i32
  }
  func.func @transform_1(%arg0: i32) -> (i32, i32) {
    %c0_i32 = arith.constant 0 : i32
    %c0_i32_0 = arith.constant 0 : i32
    %c0_i32_1 = arith.constant 0 : i32
    return %c0_i32, %c0_i32_0 : i32, i32
  }
  func.func @transform_2(%arg0: i32) -> (i32, i32) {
    %c0_i32 = arith.constant 0 : i32
    %c0_i32_0 = arith.constant 0 : i32
    %c0_i32_1 = arith.constant 0 : i32
    return %c0_i32, %c0_i32_0 : i32, i32
  }
  func.func @transform_3(%arg0: i32) -> (i32, i32) {
    %c0_i32 = arith.constant 0 : i32
    %c0_i32_0 = arith.constant 0 : i32
    %c0_i32_1 = arith.constant 0 : i32
    return %c0_i32, %c0_i32_0 : i32, i32
  }
  func.func @transform_4(%arg0: i32) -> (i32, i32) {
    %c0_i32 = arith.constant 0 : i32
    %c0_i32_0 = arith.constant 0 : i32
    %c0_i32_1 = arith.constant 0 : i32
    return %c0_i32, %c0_i32_0 : i32, i32
  }
  func.func @transform_5(%arg0: i32) -> (i32, i32) {
    %c0_i32 = arith.constant 0 : i32
    %c0_i32_0 = arith.constant 0 : i32
    %c0_i32_1 = arith.constant 0 : i32
    return %c0_i32, %c0_i32_0 : i32, i32
  }
  func.func @transform_6(%arg0: i32) -> (i32, i32) {
    %c0_i32 = arith.constant 0 : i32
    %c0_i32_0 = arith.constant 0 : i32
    %c0_i32_1 = arith.constant 0 : i32
    return %c0_i32, %c0_i32_0 : i32, i32
  }
  func.func @transform_7(%arg0: i32) -> (i32, i32) {
    %c0_i32 = arith.constant 0 : i32
    %c0_i32_0 = arith.constant 0 : i32
    return %arg0, %c0_i32 : i32, i32
  }
}

</mosaic_0001>

<bundles_post_ra>
// kernel: tpu_custom_call.1
= control target key start
LH: loop header
LB: loop body
LE: loop exit
PB: predicated region body
PF: predicated region fallthrough
CT: control target
= control target key end

     0   :  { %vm40_vm0 = vcmask 261120   ;;  %s512_s0 = inlined_call_operand.vmem [shape: f32[16,32], index: 0, kind: input, shape index: {}]   ;;  %s513_s1 = inlined_call_operand.vmem [shape: f32[32,64], index: 1, kind: input, shape index: {}]   ;;  %s514_s2 = inlined_call_operand.vmem [shape: f32[1,64], index: 2, kind: input, shape index: {}]   ;;  %s515_s3 = inlined_call_operand.vmem [shape: f32[64,32], index: 3, kind: input, shape index: {}]   ;;  %s516_s4 = inlined_call_operand.vmem [shape: f32[1,32], index: 4, kind: input, shape index: {}]   ;;  %s517_s5 = inlined_call_operand.vmem [shape: f32[1,32], index: 5, kind: input, shape index: {}]   ;;  %s518_s6 = inlined_call_operand.vmem [shape: f32[1,32], index: 6, kind: input, shape index: {}]   ;;  %s519_s7 = inlined_call_operand.hbm [shape: f32[16,32], index: 7, kind: output, shape index: {}]  }
   0x1   :  { %v29_v0 = vld [vmem:[%s513_s1] sm:$0xff]  ;;  %v30_v1 = vld [vmem:[%s513_s1 + $0x8] sm:$0xff]  ;;  %v31_v2 = vld [vmem:[%s513_s1 + $0x10] sm:$0xff] }
   0x2   :  { %v340_v3 = vpack.c.bf16 %v30_v1, %v29_v0  ;;  %v32_v4 = vld [vmem:[%s513_s1 + $0x18] sm:$0xff]  ;;  %v27_v5 = vld [vmem:[%s512_s0] sm:$0xff]  ;;  %v125_v8 = vld [vmem:[%s515_s3 + $0x8] sm:$0xff] }
   0x3   :  { %v344_v6 = vpack.c.bf16 %v32_v4, %v31_v2  ;;  %318 = vmatprep.mubr.msk.f32.mxu0 %vm40_vm0, %v27_v5  ;;  %v124_v7 = vld [vmem:[%s515_s3] sm:$0xff]  ;;  %v126_v9 = vld [vmem:[%s515_s3 + $0x10] sm:$0xff]  ;;  %v127_v11 = vld [vmem:[%s515_s3 + $0x18] sm:$0xff] }
   0x4   :  { %341 = vmatprep.subr.bf16.mxu0 %v340_v3  ;;  %v348_v10 = vpack.c.bf16 %v125_v8, %v124_v7  ;;  %v352_v12 = vpack.c.bf16 %v127_v11, %v126_v9  ;;  %v128_v13 = vld [vmem:[%s515_s3 + $0x20] sm:$0xff]  ;;  %v129_v14 = vld [vmem:[%s515_s3 + $0x28] sm:$0xff] }
   0x5   :  { %343 = vmatpush3.bf16.msra.mxu0 %v340_v3 }
   0x6   :  { %12 = vsyncpa [#allocation3], 0  ;;  %345 = vmatprep.subr.bf16.mxu0 %v344_v6  ;;  %349 = vmatprep.subr.bf16.mxu1 %v348_v10  ;;  %v356_v15 = vpack.c.bf16 %v129_v14, %v128_v13  ;;  %v28_v16 = vld [vmem:[%s512_s0 + $0x8] sm:$0xff]  ;;  %v130_v17 = vld [vmem:[%s515_s3 + $0x30] sm:$0xff]  ;;  %vm139_vm1 = vcmask 523264   ;;  %s395_s9 = smov [#allocation2]  }
   0x7   :  { %351 = vmatpush3.bf16.msra.mxu1 %v348_v10  ;;  %v131_v18 = vld [vmem:[%s515_s3 + $0x38] sm:$0xff]  ;;  %v286_v20 = vld [vmem:[%s514_s2] ss:$0 sm:$0xff]  ;;  %s275_s10 = sshll.u32 %s395_s9, 4  ;;  %s276_s10 = int_to_ptr.vmem [resolvable:$true] %s275_s10 }
   0x8   :  { %353 = vmatprep.subr.bf16.mxu1 %v352_v12  ;;  %v360_v19 = vpack.c.bf16 %v131_v18, %v130_v17  ;;  %v289_v27 = vld [vmem:[%s516_s4] ss:$0 sm:$0xff]  ;;  %s371_s11 = scalar_lea.vmem %s276_s10, 256  ;;  %p376_p1 = scmp.lt.s32.totalorder %s276_s10, %s276_s10 }
   0x9   :  { %347 = vmatpush3.bf16.msra.mxu0 %v344_v6  ;;  %v292_v53 = vld [vmem:[%s517_s5] ss:$0 sm:$0xff]  ;;  %p372_p0 = scmp.ne.s32.totalorder %s276_s10, %s371_s11  ;;  %p377_p2 = scmp.lt.s32.totalorder %s371_s11, %s371_s11 }
   0xa   :  { %v293_v55 = vld [vmem:[%s518_s6] ss:$0 sm:$0xff] }
   0xb   :  { %355 = vmatpush3.bf16.msra.mxu1 %v352_v12  ;;  %p378_p3 = por %p377_p2, %p376_p1 }
   0xc   :  { %319 = vmatmul.mubr.msk.f32.vlgmr.msra.gmra.mrb[0].mxu0 %vm40_vm0, %v28_v16  ;;  %357 = vmatprep.subr.bf16.mxu1 %v356_v15 }
   0xd   :  { %p379_p4 = pnand %p378_p3, %p372_p0 }
   0xf   :  { %359 = vmatpush3.bf16.msra.mxu1 %v356_v15 }
  0x10   :  { %361 = vmatprep.subr.bf16.mxu1 %v360_v19 }
  0x13   :  { %363 = vmatpush3.bf16.msra.mxu1 %v360_v19 }
  0xdf   :  { %v320_v21 = vpop.f32.mrb[0].mxu0 }
  0xe0   :  { %v119_v22 = vadd.f32 %v320_v21, %v286_v20  ;;  %v113_v23 = vpop.f32.mrb[1].mxu0 }
  0xe1   :  { %v114_v24 = vadd.f32 %v286_v20, %v113_v23 }
  0xe2   :  { %v123_v26 = vmax.f32 %v119_v22, 0.0 }
  0xe3   :  { %v122_v25 = vmax.f32 %v114_v24, 0.0 }
  0xe5   :  { %337 = vmatprep.mubr.msk.f32.mxu1 %vm139_vm1, %v122_v25 }
  0xe6   :  { %338 = vmatmul.mubr.msk.f32.vlgmr.msra.gmra.mrb[0].mxu1 %vm139_vm1, %v123_v26 }
 0x1b9   :  { %v339_v28 = vpop.f32.mrb[0].mxu1 }
 0x1ba   :  { %v212_v29 = vpop.f32.mrb[1].mxu1  ;;  %v218_v30 = vadd.f32 %v339_v28, %v289_v27 }
 0x1bb   :  { %v213_v31 = vadd.f32 %v289_v27, %v212_v29 }
 0x1bc   :  { %v222_v34 = vadd.f32 %v218_v30, %v28_v16 }
 0x1bd   :  { %v221_v32 = vadd.f32 %v213_v31, %v27_v5 }
 0x1be   :  { %v228_v35 = vsel %vm40_vm0, %v222_v34, 0.0 }
 0x1bf   :  { %v225_v33 = vsel %vm40_vm0, %v221_v32, 0.0 }
 0x1c0   :  { %226 = vadd.xlane.f32.xlu0 %v225_v33 }
 0x1c4   :  { %229 = vadd.xlane.f32.xlu0 %v228_v35 }
 0x24d   :  { %v227_v36 = vpop.xlane.xlu0 %226 }
 0x24e   :  { %v232_v37 = vmul.f32 0.03125, %v227_v36 }
 0x250   :  { %v234_v38 = vsub.f32 %v221_v32, %v232_v37 }
 0x251   :  { %v230_v39 = vpop.xlane.xlu0 %229 }
 0x252   :  { %v233_v40 = vmul.f32 0.03125, %v230_v39  ;;  %v236_v41 = vmul.f32 %v234_v38, %v234_v38 }
 0x254   :  { %v235_v42 = vsub.f32 %v222_v34, %v233_v40  ;;  %v238_v43 = vsel %vm40_vm0, %v236_v41, 0.0 }
 0x255   :  { %239 = vadd.xlane.f32.xlu1 %v238_v43 }
 0x256   :  { %v237_v44 = vmul.f32 %v235_v42, %v235_v42 }
 0x258   :  { %v241_v45 = vsel %vm40_vm0, %v237_v44, 0.0 }
 0x259   :  { %242 = vadd.xlane.f32.xlu1 %v241_v45 }
 0x2e2   :  { %v240_v46 = vpop.xlane.xlu1 %239 }
 0x2e3   :  { %v244_v47 = vmul.f32 0.03125, %v240_v46 }
 0x2e5   :  { %v246_v48 = vadd.f32 1e-05, %v244_v47 }
 0x2e6   :  { %v243_v49 = vpop.xlane.xlu1 %242 }
 0x2e7   :  { %367 = vrsqrt.f32 %v246_v48  ;;  %v245_v50 = vmul.f32 0.03125, %v243_v49 }
 0x2e9   :  { %v247_v51 = vadd.f32 1e-05, %v245_v50 }
 0x2eb   :  { %369 = vrsqrt.f32 %v247_v51 }
 0x2f1   :  { %v368_v52 = vpop.eup %367 }
 0x2f2   :  { %v250_v54 = vmul.f32 %v368_v52, %v234_v38 }
 0x2f4   :  { %v258_v56 = vmul.f32 %v292_v53, %v250_v54 }
 0x2f5   :  { %v370_v57 = vpop.eup %369 }
 0x2f6   :  { %v251_v58 = vmul.f32 %v370_v57, %v235_v42  ;;  %v266_v59 = vadd.f32 %v293_v55, %v258_v56 }
 0x2f8   :  { %v259_v60 = vmul.f32 %v292_v53, %v251_v58  ;;  %268 = vst.msk [vmem:[#allocation2] sm:$0xff] %vm40_vm0, %v266_v59 }
 0x2fa   :  { %v267_v61 = vadd.f32 %v293_v55, %v259_v60 }
 0x2fc   :  { %269 = vst.msk [vmem:[#allocation2 + $0x8] sm:$0xff] %vm40_vm0, %v267_v61 }
 0x2fd   :  { %382 = shalt.err (!%p379_p4)
}
 0x2fe   :  { %s383_s12 = scalar_lea.hbm %s519_s7, 256 }
 0x2ff   :  { %p384_p5 = scmp.ne.s32.totalorder %s519_s7, %s383_s12  ;;  %p387_p6 = scmp.lt.u32.totalorder %s383_s12, %s519_s7 }
 0x301   :  { %p389_p7 = pnand %p387_p6, %p384_p5 }
 0x303   :  { %392 = shalt.err (!%p389_p7)
}
 0x304   :  { %s396_s1 = smov 128   ;;  %s397_s17 = smov 8  }
 0x305   :  { %281 = dma.vmem_to_hbm [thread:$0]  %s276_s10, 256, %s519_s7, [#allocation3], %s396_s1, %s396_s1, %s397_s17  }
 0x306   :  { %393 = dma.done.wait [#allocation3], 256  }
 0x307   :  { %394 = vsyncadd [#allocation3], 4294967040 }
 0x308   :  { %285 = vsyncpa [#allocation3], 1 }

</bundles_post_ra>
